<compile_context>
chip_gen: v7x
topology: tpu7x:2x2x1
jax: 0.10.0
libtpu: 0.0.40
codegen_flags: <defaults>
</compile_context>

<pallas_src>
import functools

import jax
import jax.numpy as jnp
from jax.experimental import pallas as pl
from jax.experimental.pallas import tpu as pltpu


def _round_up(n, m):
    return ((n + m - 1) // m) * m


def _choose_tile(batch, tile_b):
    """Pick the batch tile (python ints only; shapes are static)."""
    tile_b = max(128, _round_up(int(tile_b), 128))
    if batch <= tile_b:
        if batch >= 1024:
            # Split into ~2 steps so v7x's two TensorCores both get work.
            half = _round_up((batch + 1) // 2, 128)
            if half < batch:
                return half
        return batch          # single exact block: block dims == array dims
    return tile_b


def fcgp_kernel(x_ref, w1_ref, b1_ref, w2_ref, b2_ref, wht_ref, bht_ref,
                lo_ref, hi_ref, out_ref, *, matmul_dtype):
    # Cast x to the MXU dtype inside the kernel (no wrapper-side HBM pass).
    x = x_ref[...].astype(matmul_dtype)
    # input layer + ReLU (MXU in matmul_dtype, f32 accumulate, f32 epilogue)
    h = jnp.dot(x, w1_ref[...], preferred_element_type=jnp.float32) + b1_ref[...]
    h = jnp.maximum(h, 0.0).astype(matmul_dtype)
    # hidden layer + ReLU  (hidden_dims=(32, 32) -> one hidden Linear)
    h = jnp.dot(h, w2_ref[...], preferred_element_type=jnp.float32) + b2_ref[...]
    h = jnp.maximum(h, 0.0).astype(matmul_dtype)
    # fused heads, transposed: wh_t (A2, H2) contracted with h (TILE_B, H2)
    # on the H2 axis -> y (A2, TILE_B), so the store is lane-dense on batch.
    y = jax.lax.dot_general(
        wht_ref[...], h, (((1,), (1,)), ((), ())),
        preferred_element_type=jnp.float32)
    y = y + bht_ref[...]                       # (A2, 1) broadcast over lanes
    # Clamp only the log_std sublanes via precomputed per-row lo/hi vectors
    # (mean rows use +-3e38 so the clip is a no-op there).
    y = jnp.clip(y, lo_ref[...], hi_ref[...])
    out_ref[...] = y.astype(out_ref.dtype)


def prepare_fcgp_params(params, log_std_min=-20.0, log_std_max=2.0,
                        use_bf16=False):
    """One-time parameter prep (hoisted out of the per-call forward)."""
    w1, b1, w2, b2, wm, bm, ws, bs = params
    A = wm.shape[1]
    mdt = jnp.bfloat16 if use_bf16 else jnp.float32

    wh_t = jnp.concatenate([wm, ws], axis=1).T          # (2A, H2)
    bh_t = jnp.concatenate([bm, bs], axis=1).T          # (2A, 1)
    big = jnp.float32(3.0e38)
    lo = jnp.concatenate(
        [jnp.full((A, 1), -big, jnp.float32),
         jnp.full((A, 1), log_std_min, jnp.float32)], axis=0)
    hi = jnp.concatenate(
        [jnp.full((A, 1), big, jnp.float32),
         jnp.full((A, 1), log_std_max, jnp.float32)], axis=0)

    return {
        "w1": w1.astype(mdt), "b1": b1.astype(jnp.float32),
        "w2": w2.astype(mdt), "b2": b2.astype(jnp.float32),
        "wh_t": wh_t.astype(mdt), "bh_t": bh_t.astype(jnp.float32),
        "lo": lo, "hi": hi,
        "action_dim": A, "matmul_dtype": mdt,
    }


def fcgp_forward(x, prepped, *, tile_b=2048):
    """Pallas implementation of FCGP.forward: returns (mean, log_std)."""
    w1, b1 = prepped["w1"], prepped["b1"]
    w2, b2 = prepped["w2"], prepped["b2"]
    wh_t, bh_t = prepped["wh_t"], prepped["bh_t"]
    lo, hi = prepped["lo"], prepped["hi"]
    A = prepped["action_dim"]
    mdt = prepped["matmul_dtype"]

    B, D = x.shape
    H1 = w1.shape[1]
    H2 = w2.shape[1]
    A2 = 2 * A

    TILE_B = _choose_tile(B, tile_b)
    grid = (pl.cdiv(B, TILE_B),)

    kernel = functools.partial(fcgp_kernel, matmul_dtype=mdt)

    flops = 2 * B * (D * H1 + H1 * H2 + H2 * A2)
    bytes_accessed = (
        B * D * x.dtype.itemsize + B * A2 * 4 +
        sum(int(a.size) * a.dtype.itemsize
            for a in (w1, b1, w2, b2, wh_t, bh_t, lo, hi)))

    out_t = pl.pallas_call(
        kernel,
        out_shape=jax.ShapeDtypeStruct((A2, B), jnp.float32),
        grid=grid,
        in_specs=[
            pl.BlockSpec((TILE_B, D), lambda i: (i, 0)),   # x: tiled on batch
            pl.BlockSpec((D, H1), lambda i: (0, 0)),       # weights resident
            pl.BlockSpec((1, H1), lambda i: (0, 0)),
            pl.BlockSpec((H1, H2), lambda i: (0, 0)),
            pl.BlockSpec((1, H2), lambda i: (0, 0)),
            pl.BlockSpec((A2, H2), lambda i: (0, 0)),
            pl.BlockSpec((A2, 1), lambda i: (0, 0)),
            pl.BlockSpec((A2, 1), lambda i: (0, 0)),
            pl.BlockSpec((A2, 1), lambda i: (0, 0)),
        ],
        out_specs=pl.BlockSpec((A2, TILE_B), lambda i: (0, i)),
        compiler_params=pltpu.CompilerParams(
            dimension_semantics=("parallel",)),
        cost_estimate=pl.CostEstimate(
            flops=flops, transcendentals=0, bytes_accessed=bytes_accessed),
    )(x, w1, b1, w2, b2, wh_t, bh_t, lo, hi)

    # Tiny (A, B) -> (B, A) transposes so the caller sees PyTorch layout.
    mean = out_t[:A, :].T
    log_std = out_t[A:, :].T
    return mean, log_std


def init_linear(key, fan_in, fan_out):
    # Deterministic init mimicking nn.Linear's U(-1/sqrt(fan_in), 1/sqrt(fan_in)).
    kw, kb = jax.random.split(key)
    bound = 1.0 / jnp.sqrt(jnp.float32(fan_in))
    w = jax.random.uniform(kw, (fan_in, fan_out), jnp.float32, -bound, bound)
    b = jax.random.uniform(kb, (1, fan_out), jnp.float32, -bound, bound)
    return w, b


def reference_forward(x, params, log_std_min=-20.0, log_std_max=2.0):
    w1, b1, w2, b2, wm, bm, ws, bs = params
    h = jnp.maximum(x @ w1 + b1, 0.0)
    h = jnp.maximum(h @ w2 + b2, 0.0)
    mean = h @ wm + bm
    log_std = jnp.clip(h @ ws + bs, log_std_min, log_std_max)
    return mean, log_std


if __name__ == "__main__":
    # Module config: input_dim=16, hidden_dims=(32, 32),
    # action_bounds=([-1,-1], [1,1]) -> action_dim = 2, batch = 2.
    B, input_dim, H1, H2, action_dim = 2, 16, 32, 32, 2

    key = jax.random.PRNGKey(0)
    k_x, k1, k2, k3, k4, k_big, k_rag = jax.random.split(key, 7)

    x = jax.random.normal(k_x, (B, input_dim), jnp.float32)

    w1, b1 = init_linear(k1, input_dim, H1)     # input_layer
    w2, b2 = init_linear(k2, H1, H2)            # hidden_layers[0]
    wm, bm = init_linear(k3, H2, action_dim)    # output_layer_mean
    ws, bs = init_linear(k4, H2, action_dim)    # output_layer_log_std
    params = (w1, b1, w2, b2, wm, bm, ws, bs)

    # One-time parameter prep (head fusion/transpose, clamp vectors).
    prepped_f32 = prepare_fcgp_params(params)                   # f32 (v5e-safe)
    prepped_bf16 = prepare_fcgp_params(params, use_bf16=True)   # v6e/v7x path

    # TODO(synk): full_pass / _get_actions (Normal sampling, tanh rescale) are
    # host-side stochastic policy logic, not part of the forward hot path.

    # 1) Small-batch f32 path (matches the module's default precision).
    mean, log_std = fcgp_forward(x, prepped_f32)
    jax.block_until_ready((mean, log_std))
    ref_mean, ref_log_std = reference_forward(x, params)
    assert jnp.allclose(mean, ref_mean, atol=1e-5), "mean mismatch"
    assert jnp.allclose(log_std, ref_log_std, atol=1e-5), "log_std mismatch"

    # 2) Medium batch, single exact block (no padding, lane-dense store).
    xb = jax.random.normal(k_big, (1000, input_dim), jnp.float32)
    mean_b, log_std_b = fcgp_forward(xb, prepped_f32)
    jax.block_until_ready((mean_b, log_std_b))
    ref_mean_b, ref_log_std_b = reference_forward(xb, params)
    assert jnp.allclose(mean_b, ref_mean_b, atol=1e-5), "mean mismatch (B=1000)"
    assert jnp.allclose(log_std_b, ref_log_std_b, atol=1e-5), "log_std mismatch (B=1000)"

    # 3) Multi-step grid with a ragged last block (cdiv grid, no jnp.pad).
    xr = jax.random.normal(k_rag, (2500, input_dim), jnp.float32)
    mean_r, log_std_r = fcgp_forward(xr, prepped_f32, tile_b=1024)
    jax.block_until_ready((mean_r, log_std_r))
    ref_mean_r, ref_log_std_r = reference_forward(xr, params)
    assert jnp.allclose(mean_r, ref_mean_r, atol=1e-5), "grid mean mismatch"
    assert jnp.allclose(log_std_r, ref_log_std_r, atol=1e-5), "grid log_std mismatch"

    # 4) bf16 MXU path (recommended on v6e/v7x; cast happens in-kernel so no
    #    extra HBM pass over x), looser tolerance.
    mean_h, log_std_h = fcgp_forward(xr, prepped_bf16, tile_b=1024)
    jax.block_until_ready((mean_h, log_std_h))
    assert jnp.allclose(mean_h, ref_mean_r, atol=5e-2), "bf16 mean mismatch"
    assert jnp.allclose(log_std_h, ref_log_std_r, atol=5e-2), "bf16 log_std mismatch"

    print("KERNEL_OK")
</pallas_src>

<mosaic_0001>
module attributes {stable_mosaic.version = 11 : i64} {
  func.func @fcgp_kernel(%arg0: i32, %arg1: memref<2x16xf32, #tpu.memory_space<vmem>>, %arg2: memref<16x32xf32, #tpu.memory_space<vmem>>, %arg3: memref<1x32xf32, #tpu.memory_space<vmem>>, %arg4: memref<32x32xf32, #tpu.memory_space<vmem>>, %arg5: memref<1x32xf32, #tpu.memory_space<vmem>>, %arg6: memref<4x32xf32, #tpu.memory_space<vmem>>, %arg7: memref<4x1xf32, #tpu.memory_space<vmem>>, %arg8: memref<4x1xf32, #tpu.memory_space<vmem>>, %arg9: memref<4x1xf32, #tpu.memory_space<vmem>>, %arg10: memref<4x2xf32, #tpu.memory_space<vmem>>) attributes {dimension_semantics = [#tpu.dimension_semantics<parallel>], iteration_bounds = array<i64: 1>, scalar_prefetch = 0 : i64, scratch_operands = 0 : i64, tpu.core_type = #tpu.core_type<tc>, window_params = [{transform_indices = @transform_0, window_bounds = array<i64: 2, 16>}, {pipeline_mode = #tpu.pipeline_mode<synchronous>, transform_indices = @transform_1, window_bounds = array<i64: 16, 32>}, {pipeline_mode = #tpu.pipeline_mode<synchronous>, transform_indices = @transform_2, window_bounds = array<i64: 1, 32>}, {pipeline_mode = #tpu.pipeline_mode<synchronous>, transform_indices = @transform_3, window_bounds = array<i64: 32, 32>}, {pipeline_mode = #tpu.pipeline_mode<synchronous>, transform_indices = @transform_4, window_bounds = array<i64: 1, 32>}, {pipeline_mode = #tpu.pipeline_mode<synchronous>, transform_indices = @transform_5, window_bounds = array<i64: 4, 32>}, {pipeline_mode = #tpu.pipeline_mode<synchronous>, transform_indices = @transform_6, window_bounds = array<i64: 4, 1>}, {pipeline_mode = #tpu.pipeline_mode<synchronous>, transform_indices = @transform_7, window_bounds = array<i64: 4, 1>}, {pipeline_mode = #tpu.pipeline_mode<synchronous>, transform_indices = @transform_8, window_bounds = array<i64: 4, 1>}, {transform_indices = @transform_9, window_bounds = array<i64: 4, 2>}]} {
    %c0 = arith.constant 0 : index
    %c0_0 = arith.constant 0 : index
    %0 = vector.load %arg1[%c0, %c0_0] : memref<2x16xf32, #tpu.memory_space<vmem>>, vector<2x16xf32>
    %c0_1 = arith.constant 0 : index
    %c0_2 = arith.constant 0 : index
    %1 = vector.load %arg2[%c0_1, %c0_2] : memref<16x32xf32, #tpu.memory_space<vmem>>, vector<16x32xf32>
    %cst = arith.constant dense<0.000000e+00> : vector<2x32xf32>
    %2 = tpu.matmul %0, %1, %cst {dimension_numbers = #tpu.dot_dimension_numbers<[1], [0], [0], [1], [0, 0, 1, 1], [], []>} : vector<2x16xf32>, vector<16x32xf32>, vector<2x32xf32> -> vector<2x32xf32>
    %c0_3 = arith.constant 0 : index
    %c0_4 = arith.constant 0 : index
    %3 = vector.load %arg3[%c0_3, %c0_4] : memref<1x32xf32, #tpu.memory_space<vmem>>, vector<1x32xf32>
    %4 = vector.broadcast %3 : vector<1x32xf32> to vector<2x32xf32>
    %5 = arith.addf %2, %4 : vector<2x32xf32>
    %cst_5 = arith.constant 0.000000e+00 : f32
    %6 = vector.broadcast %cst_5 : f32 to vector<2x32xf32>
    %7 = arith.maximumf %5, %6 : vector<2x32xf32>
    %c0_6 = arith.constant 0 : index
    %c0_7 = arith.constant 0 : index
    %8 = vector.load %arg4[%c0_6, %c0_7] : memref<32x32xf32, #tpu.memory_space<vmem>>, vector<32x32xf32>
    %cst_8 = arith.constant dense<0.000000e+00> : vector<2x32xf32>
    %9 = tpu.matmul %7, %8, %cst_8 {dimension_numbers = #tpu.dot_dimension_numbers<[1], [0], [0], [1], [0, 0, 1, 1], [], []>} : vector<2x32xf32>, vector<32x32xf32>, vector<2x32xf32> -> vector<2x32xf32>
    %c0_9 = arith.constant 0 : index
    %c0_10 = arith.constant 0 : index
    %10 = vector.load %arg5[%c0_9, %c0_10] : memref<1x32xf32, #tpu.memory_space<vmem>>, vector<1x32xf32>
    %11 = vector.broadcast %10 : vector<1x32xf32> to vector<2x32xf32>
    %12 = arith.addf %9, %11 : vector<2x32xf32>
    %cst_11 = arith.constant 0.000000e+00 : f32
    %13 = vector.broadcast %cst_11 : f32 to vector<2x32xf32>
    %14 = arith.maximumf %12, %13 : vector<2x32xf32>
    %c0_12 = arith.constant 0 : index
    %c0_13 = arith.constant 0 : index
    %15 = vector.load %arg6[%c0_12, %c0_13] : memref<4x32xf32, #tpu.memory_space<vmem>>, vector<4x32xf32>
    %cst_14 = arith.constant dense<0.000000e+00> : vector<4x2xf32>
    %16 = tpu.matmul %15, %14, %cst_14 {dimension_numbers = #tpu.dot_dimension_numbers<[1], [1], [0], [0], [0, 0, 1, 0], [], []>} : vector<4x32xf32>, vector<2x32xf32>, vector<4x2xf32> -> vector<4x2xf32>
    %c0_15 = arith.constant 0 : index
    %c0_16 = arith.constant 0 : index
    %17 = vector.load %arg7[%c0_15, %c0_16] : memref<4x1xf32, #tpu.memory_space<vmem>>, vector<4x1xf32>
    %18 = vector.broadcast %17 : vector<4x1xf32> to vector<4x2xf32>
    %19 = arith.addf %16, %18 : vector<4x2xf32>
    %c0_17 = arith.constant 0 : index
    %c0_18 = arith.constant 0 : index
    %20 = vector.load %arg8[%c0_17, %c0_18] : memref<4x1xf32, #tpu.memory_space<vmem>>, vector<4x1xf32>
    %c0_19 = arith.constant 0 : index
    %c0_20 = arith.constant 0 : index
    %21 = vector.load %arg9[%c0_19, %c0_20] : memref<4x1xf32, #tpu.memory_space<vmem>>, vector<4x1xf32>
    %22 = vector.broadcast %20 : vector<4x1xf32> to vector<4x2xf32>
    %23 = arith.maximumf %22, %19 : vector<4x2xf32>
    %24 = vector.broadcast %21 : vector<4x1xf32> to vector<4x2xf32>
    %25 = arith.minimumf %24, %23 : vector<4x2xf32>
    %c0_21 = arith.constant 0 : index
    %c0_22 = arith.constant 0 : index
    %26 = vector.load %arg10[%c0_21, %c0_22] : memref<4x2xf32, #tpu.memory_space<vmem>>, vector<4x2xf32>
    tpu.vector_store %arg10[%c0_21, %c0_22], %25 {strides = array<i32>} : memref<4x2xf32, #tpu.memory_space<vmem>>, vector<4x2xf32>,
    return
  }
  func.func @transform_0(%arg0: i32) -> (i32, i32) {
    %c0_i32 = arith.constant 0 : i32
    %c0_i32_0 = arith.constant 0 : i32
    return %arg0, %c0_i32 : i32, i32
  }
  func.func @transform_1(%arg0: i32) -> (i32, i32) {
    %c0_i32 = arith.constant 0 : i32
    %c0_i32_0 = arith.constant 0 : i32
    %c0_i32_1 = arith.constant 0 : i32
    return %c0_i32, %c0_i32_0 : i32, i32
  }
  func.func @transform_2(%arg0: i32) -> (i32, i32) {
    %c0_i32 = arith.constant 0 : i32
    %c0_i32_0 = arith.constant 0 : i32
    %c0_i32_1 = arith.constant 0 : i32
    return %c0_i32, %c0_i32_0 : i32, i32
  }
  func.func @transform_3(%arg0: i32) -> (i32, i32) {
    %c0_i32 = arith.constant 0 : i32
    %c0_i32_0 = arith.constant 0 : i32
    %c0_i32_1 = arith.constant 0 : i32
    return %c0_i32, %c0_i32_0 : i32, i32
  }
  func.func @transform_4(%arg0: i32) -> (i32, i32) {
    %c0_i32 = arith.constant 0 : i32
    %c0_i32_0 = arith.constant 0 : i32
    %c0_i32_1 = arith.constant 0 : i32
    return %c0_i32, %c0_i32_0 : i32, i32
  }
  func.func @transform_5(%arg0: i32) -> (i32, i32) {
    %c0_i32 = arith.constant 0 : i32
    %c0_i32_0 = arith.constant 0 : i32
    %c0_i32_1 = arith.constant 0 : i32
    return %c0_i32, %c0_i32_0 : i32, i32
  }
  func.func @transform_6(%arg0: i32) -> (i32, i32) {
    %c0_i32 = arith.constant 0 : i32
    %c0_i32_0 = arith.constant 0 : i32
    %c0_i32_1 = arith.constant 0 : i32
    return %c0_i32, %c0_i32_0 : i32, i32
  }
  func.func @transform_7(%arg0: i32) -> (i32, i32) {
    %c0_i32 = arith.constant 0 : i32
    %c0_i32_0 = arith.constant 0 : i32
    %c0_i32_1 = arith.constant 0 : i32
    return %c0_i32, %c0_i32_0 : i32, i32
  }
  func.func @transform_8(%arg0: i32) -> (i32, i32) {
    %c0_i32 = arith.constant 0 : i32
    %c0_i32_0 = arith.constant 0 : i32
    %c0_i32_1 = arith.constant 0 : i32
    return %c0_i32, %c0_i32_0 : i32, i32
  }
  func.func @transform_9(%arg0: i32) -> (i32, i32) {
    %c0_i32 = arith.constant 0 : i32
    %c0_i32_0 = arith.constant 0 : i32
    return %c0_i32, %arg0 : i32, i32
  }
}

</mosaic_0001>

<bundles_post_ra>
// kernel: tpu_custom_call.1
= control target key start
LH: loop header
LB: loop body
LE: loop exit
PB: predicated region body
PF: predicated region fallthrough
CT: control target
= control target key end

     0   :  { %14 = vsyncpa [#allocation3], 0  ;;  %s562_s0 = inlined_call_operand.vmem [shape: f32[2,16], index: 0, kind: input, shape index: {}]   ;;  %s563_s1 = inlined_call_operand.vmem [shape: f32[16,32], index: 1, kind: input, shape index: {}]   ;;  %s564_s2 = inlined_call_operand.hbm [shape: f32[1,32], index: 2, kind: input, shape index: {}]   ;;  %s565_s3 = inlined_call_operand.hbm [shape: f32[32,32], index: 3, kind: input, shape index: {}]   ;;  %s566_s4 = inlined_call_operand.vmem [shape: f32[1,32], index: 4, kind: input, shape index: {}]   ;;  %s567_s5 = inlined_call_operand.vmem [shape: f32[4,32], index: 5, kind: input, shape index: {}]   ;;  %s568_s6 = inlined_call_operand.vmem [shape: f32[4,1], index: 6, kind: input, shape index: {}]   ;;  %s569_s7 = inlined_call_operand.vmem [shape: f32[4,1], index: 7, kind: input, shape index: {}]   ;;  %s570_s8 = inlined_call_operand.vmem [shape: f32[4,1], index: 8, kind: input, shape index: {}]   ;;  %s571_s9 = inlined_call_operand.vmem [shape: f32[4,2], index: 9, kind: output, shape index: {}]  }
   0x1   :  { %15 = vsyncpa [#allocation5], 0  ;;  %s440_s30 = smov [#allocation2]   ;;  %s441_s11 = smov [#allocation4]  }
   0x2   :  { %s26_s10 = sshll.u32 %s440_s30, 4  ;;  %s35_s12 = sshll.u32 %s441_s11, 4  ;;  %s27_s10 = int_to_ptr.vmem [resolvable:$true] %s26_s10  ;;  %s498_s12 = int_to_ptr.vmem [resolvable:$true] %s35_s12 }
   0x3   :  { %s392_s15 = scalar_lea.hbm %s564_s2, 16 }
   0x4   :  { %p393_p0 = scmp.ne.s32.totalorder %s564_s2, %s392_s15  ;;  %p396_p1 = scmp.lt.u32.totalorder %s392_s15, %s564_s2 }
   0x6   :  { %p398_p2 = pnand %p396_p1, %p393_p0 }
   0x8   :  { %401 = shalt.err (!%p398_p2)
}
   0x9   :  { %s402_s20 = scalar_lea.vmem %s27_s10, 16  ;;  %s406_s21 = scalar_lea.vmem %s27_s10, 32 }
   0xa   :  { %p403_p3 = scmp.ne.s32.totalorder %s27_s10, %s402_s20  ;;  %p407_p4 = scmp.lt.s32.totalorder %s27_s10, %s27_s10 }
   0xb   :  { %p408_p5 = scmp.lt.s32.totalorder %s406_s21, %s402_s20 }
   0xd   :  { %p409_p6 = por %p408_p5, %p407_p4 }
   0xf   :  { %p410_p7 = pnand %p409_p6, %p403_p3 }
  0x11   :  { %413 = shalt.err (!%p410_p7)
}
  0x12   :  { %29 = dma.hbm_to_vmem [thread:$0]  %s564_s2, 16, %s27_s10, [#allocation3]  }
  0x13   :  { %s414_s26 = scalar_lea.hbm %s565_s3, 512 }
  0x14   :  { %p415_p8 = scmp.ne.s32.totalorder %s565_s3, %s414_s26  ;;  %p418_p9 = scmp.lt.u32.totalorder %s414_s26, %s565_s3 }
  0x16   :  { %p420_p10 = pnand %p418_p9, %p415_p8 }
  0x18   :  { %423 = shalt.err (!%p420_p10)
}
  0x19   :  { %s424_s11 = scalar_lea.vmem %s498_s12, 512  ;;  %p429_p12 = scmp.lt.s32.totalorder %s498_s12, %s498_s12 }
  0x1a   :  { %p425_p11 = scmp.ne.s32.totalorder %s498_s12, %s424_s11  ;;  %p430_p13 = scmp.lt.s32.totalorder %s424_s11, %s424_s11 }
  0x1c   :  { %p431_p0 = por %p430_p13, %p429_p12 }
  0x1e   :  { %p432_p1 = pnand %p431_p0, %p425_p11 }
  0x20   :  { %435 = shalt.err (!%p432_p1)
}
  0x21   :  { %s442_s2 = smov 128   ;;  %s443_s10 = smov 8  }
  0x22   :  { %41 = dma.hbm_to_vmem [thread:$0]  %s565_s3, 512, %s498_s12, [#allocation5], %s442_s2, %s442_s2, %s443_s10  }
  0x23   :  { %436 = dma.done.wait [#allocation3], 16  }
  0x24   :  { %437 = vsyncadd [#allocation3], 4294967280 }
  0x25   :  { %438 = dma.done.wait [#allocation5], 512  }
  0x26   :  { %439 = vsyncadd [#allocation5], 4294966784  ;;  %v444_v0 = vmov 0.0|0.0   ;;  %vm445_vm0 = vmmov 0   ;;  %v446_v1 = vmov 0.0   ;;  %v59_v2 = vld [vmem:[%s563_s1] sm:$0xff] }
  0x27   :  { %373 = vmatprep.subr.bf16.mxu0 %v444_v0  ;;  %354 = vmatprep.mubr.msk.f32.mxu0 %vm445_vm0, %v446_v1  ;;  %v60_v3 = vld [vmem:[%s563_s1 + $0x8] sm:$0xff]  ;;  %v58_v8 = vld [vmem:[%s562_s0] sm:$0x3]  ;;  %vm68_vm1 = vcmask 130048   ;;  %v145_v9 = vld [vmem:[#allocation4 + $0x10] sm:$0xff]  ;;  %vm154_vm2 = vcmask 261120  }
  0x28   :  { %376 = vmatprep.subr.bf16.mxu1 %v444_v0  ;;  %365 = vmatprep.mubr.msk.f32.mxu1 %vm445_vm0, %v446_v1  ;;  %v374_v4 = vpack.c.bf16 %v60_v3, %v59_v2  ;;  %v143_v5 = vld [vmem:[#allocation4] sm:$0xff]  ;;  %v144_v6 = vld [vmem:[#allocation4 + $0x8] sm:$0xff]  ;;  %v146_v10 = vld [vmem:[#allocation4 + $0x18] sm:$0xff]  ;;  %v447_v18 = vmov 0   ;;  %vm326_vm3 = vcmask 11264  }
  0x29   :  { %v377_v7 = vpack.c.bf16 %v144_v6, %v143_v5  ;;  %v380_v11 = vpack.c.bf16 %v146_v10, %v145_v9  ;;  %v334_v12 = vld [vmem:[#allocation2] ss:$0 sm:$0xff]  ;;  %390 = vset.pattern.permute.xlu0 %v447_v18  ;;  %391 = vset.pattern.permute.xlu1 %v447_v18 }
  0x2a   :  { %375 = vmatpush3.bf16.msra.mxu0 %v374_v4  ;;  %v230_v17 = vld [vmem:[%s568_s6] sm:$0xf] }
  0x2b   :  { %378 = vmatpush3.bf16.msra.mxu1 %v377_v7  ;;  %368 = vmatprep.subr.mxu0 %v446_v1  ;;  %v313_v19 = vld [vmem:[%s570_s8] sm:$0xf] }
  0x2c   :  { %379 = vmatprep.subr.bf16.mxu1 %v444_v0  ;;  %233 = vperm.xlu0 %390, %v230_v17   ;;  %v312_v20 = vld [vmem:[%s569_s7] sm:$0xf] }
  0x2d   :  { %355 = vmatmul.mubr.msk.f32.vlgmr.msra.gmra.mrb[0].mxu0 %vm68_vm1, %v58_v8  ;;  %322 = vperm.xlu1 %391, %v313_v19   ;;  %v336_v21 = vld [vmem:[%s566_s4] ss:$0 sm:$0xff] }
  0x2e   :  { %370 = vmatprep.mubr.msk.f32.mxu0 %vm445_vm0, %v446_v1  ;;  %v229_v26 = vld [vmem:[%s567_s5] sm:$0xf] }
  0x2f   :  { %381 = vmatpush3.bf16.msra.mxu1 %v380_v11 }
  0x30   :  { %316 = vperm.xlu0 %390, %v312_v20  }
  0xab   :  { %v234_v27 = vpop.permute.xlu0 %233 }
  0xac   :  { %v323_v32 = vpop.permute.xlu1 %322 }
  0xaf   :  { %v317_v31 = vpop.permute.xlu0 %316 }
 0x100   :  { %v138_v13 = vpop.f32.mrb[0].mxu0 }
 0x101   :  { %v139_v14 = vadd.f32 %v334_v12, %v138_v13  ;;  %v356_v15 = vpop.f32.mrb[1].mxu0 }
 0x103   :  { %v142_v16 = vmax.f32 %v139_v14, 0.0 }
 0x105   :  { %366 = vmatmul.mubr.msk.f32.vlgmr.msra.gmra.mrb[0].mxu1 %vm154_vm2, %v142_v16 }
 0x1d8   :  { %v224_v22 = vpop.f32.mrb[0].mxu1 }
 0x1d9   :  { %v225_v23 = vadd.f32 %v336_v21, %v224_v22  ;;  %v367_v24 = vpop.f32.mrb[1].mxu1 }
 0x1db   :  { %v228_v25 = vmax.f32 %v225_v23, 0.0 }
 0x1dd   :  { %369 = vmatpush3.xpose.msk.msra.mxu0 %vm154_vm2, %v228_v25 }
 0x1e0   :  { %371 = vmatmul.mubr.msk.f32.vlgmr.msra.gmra.mrb[2].mxu0 %vm154_vm2, %v229_v26 }
 0x2b3   :  { %v308_v28 = vpop.f32.mrb[2].mxu0 }
 0x2b4   :  { %v309_v29 = vadd.f32 %v308_v28, %v234_v27  ;;  %v372_v30 = vpop.f32.mrb[3].mxu0 }
 0x2b6   :  { %v319_v33 = vmax.f32 %v317_v31, %v309_v29 }
 0x2b8   :  { %v325_v34 = vmin.f32 %v323_v32, %v319_v33 }
 0x2ba   :  { %327 = vst.msk [vmem:[%s571_s9] sm:$0xf] %vm326_vm3, %v325_v34 }
 0x2bb   :  { %332 = vsyncpa [#allocation3], 1 }
 0x2bc   :  { %333 = vsyncpa [#allocation5], 1 }

</bundles_post_ra>
